<compile_context>
chip_gen: v7x
topology: tpu7x:2x2x1
jax: 0.10.0
libtpu: 0.0.40
codegen_flags: <defaults>
</compile_context>

<pallas_src>
import functools

import jax
import jax.numpy as jnp
from jax.experimental import pallas as pl
from jax.experimental.pallas import tpu as pltpu

LANE = 128                       # TPU lane width
_MAX_TK = 2048                   # largest streamed patch K-slab per grid step
_VMEM_LIMIT = 48 * 1024 * 1024   # explicit scoped-VMEM budget (< v7x 64 MiB)


def _round_up(x, m):
    return (x + m - 1) // m * m


def _m_tiling(M):
    """Pick (TM, Mp).  For M >= 256: >=2 roughly balanced 16-aligned tiles
    (megacore-friendly), no M padding (ragged last tile = masked edge block).
    Tiny M: one 16-aligned padded tile (bf16 sublane packing)."""
    if M >= 256:
        ntiles = max(2, pl.cdiv(M, 512))             # target ~512-row tiles
        tm = _round_up(pl.cdiv(M, ntiles), 16)
        return tm, M
    tm = _round_up(max(M, 1), 16)
    return tm, tm


def _pick_tk(Kp):
    """K-slab size for the streamed patch tiles.  The weight slab itself is
    fully VMEM-resident, so TK only bounds the per-step patch DMA."""
    if Kp <= _MAX_TK:
        return Kp
    for tk in (2048, 1024, 512, 256, 128):
        if Kp % tk == 0:
            return tk
    return Kp


def _conv_gemm_kernel(x_ref, w_ref, b_ref, o_ref, acc_ref, *, tk,
                      negative_slope):
    """Multi-K-step path: (TM, TK) patch tile @ K-slice of the VMEM-resident
    (Kp, Cp) weight, accumulated in an f32 scratch across the K grid axis."""
    k = pl.program_id(1)

    @pl.when(k == 0)
    def _init():
        acc_ref[...] = jnp.zeros_like(acc_ref)

    off = pl.multiple_of(k * tk, tk)
    acc_ref[...] += jnp.dot(x_ref[...], w_ref[pl.ds(off, tk), :],
                            preferred_element_type=jnp.float32)

    @pl.when(k == pl.num_programs(1) - 1)
    def _finalize():
        acc = acc_ref[...] + b_ref[...]
        if negative_slope is not None:
            acc = jnp.where(acc > 0, acc, acc * negative_slope)
        o_ref[...] = acc.astype(o_ref.dtype)


def _conv_gemm_kernel_1k(x_ref, w_ref, b_ref, o_ref, *, negative_slope):
    """Single-K-step path: no scratch, no init/finalize dance."""
    acc = jnp.dot(x_ref[...], w_ref[...], preferred_element_type=jnp.float32)
    acc = acc + b_ref[...]
    if negative_slope is not None:
        acc = jnp.where(acc > 0, acc, acc * negative_slope)
    o_ref[...] = acc.astype(o_ref.dtype)


def _fused_conv_gemm(patches, layer, negative_slope, out_dtype):
    """patches: (M, Kp) bf16; layer holds pre-padded bf16 weights -> (M, Cout)."""
    M, K = patches.shape
    Kp, Cp, cout, TK = layer["Kp"], layer["Cp"], layer["cout"], layer["tk"]
    assert K == Kp, (K, Kp)                  # channels were padded upstream
    w2d, b2d = layer["w2d"], layer["b2d"]

    TM, Mp = _m_tiling(M)
    if Mp != M:
        patches = jnp.pad(patches, ((0, Mp - M), (0, 0)))
    patches = patches.astype(jnp.bfloat16)

    n_m = pl.cdiv(Mp, TM)
    n_k = Kp // TK
    cost = pl.CostEstimate(
        flops=2 * M * Kp * Cp,
        transcendentals=0,
        bytes_accessed=(Mp * Kp * 2 + Kp * Cp * 2 + Cp * 4
                        + Mp * Cp * jnp.dtype(out_dtype).itemsize),
    )

    if n_k == 1:
        out = pl.pallas_call(
            functools.partial(_conv_gemm_kernel_1k,
                              negative_slope=negative_slope),
            out_shape=jax.ShapeDtypeStruct((Mp, Cp), out_dtype),
            grid_spec=pltpu.PrefetchScalarGridSpec(
                num_scalar_prefetch=0,
                grid=(n_m,),
                in_specs=[
                    pl.BlockSpec((TM, Kp), lambda i: (i, 0)),   # patch tile
                    pl.BlockSpec((Kp, Cp), lambda i: (0, 0)),   # resident W
                    pl.BlockSpec((1, Cp), lambda i: (0, 0)),    # f32 bias row
                ],
                out_specs=pl.BlockSpec((TM, Cp), lambda i: (i, 0)),
            ),
            compiler_params=pltpu.CompilerParams(
                dimension_semantics=("parallel",),
                vmem_limit_bytes=_VMEM_LIMIT),
            cost_estimate=cost,
        )(patches, w2d, b2d)
    else:
        out = pl.pallas_call(
            functools.partial(_conv_gemm_kernel, tk=TK,
                              negative_slope=negative_slope),
            out_shape=jax.ShapeDtypeStruct((Mp, Cp), out_dtype),
            grid_spec=pltpu.PrefetchScalarGridSpec(
                num_scalar_prefetch=0,
                grid=(n_m, n_k),
                in_specs=[
                    pl.BlockSpec((TM, TK), lambda i, k: (i, k)),  # patch tile
                    pl.BlockSpec((Kp, Cp), lambda i, k: (0, 0)),  # resident W
                    pl.BlockSpec((1, Cp), lambda i, k: (0, 0)),   # bias row
                ],
                out_specs=pl.BlockSpec((TM, Cp), lambda i, k: (i, 0)),
                scratch_shapes=[pltpu.VMEM((TM, Cp), jnp.float32)],
            ),
            compiler_params=pltpu.CompilerParams(
                dimension_semantics=("parallel", "arbitrary"),
                vmem_limit_bytes=_VMEM_LIMIT),
            cost_estimate=cost,
        )(patches, w2d, b2d)

    if Mp != M or Cp != cout:
        out = out[:M, :cout]
    return out


def _im2col_nhwc(x, kh, kw, stride, pad):
    """x: (N, H, W, C) -> (N*Ho*Wo, kh*kw*C) with (kh, kw, C) flattening."""
    N, H, W, C = x.shape
    xpad = jnp.pad(x, ((0, 0), (pad, pad), (pad, pad), (0, 0)))
    Ho = (H + 2 * pad - kh) // stride + 1
    Wo = (W + 2 * pad - kw) // stride + 1
    cols = [xpad[:, i:i + stride * Ho:stride, j:j + stride * Wo:stride, :]
            for i in range(kh) for j in range(kw)]
    patches = jnp.concatenate(cols, axis=-1)          # (N, Ho, Wo, kh*kw*C)
    return patches.reshape(N * Ho * Wo, kh * kw * C), (N, Ho, Wo)


def conv2d_pallas(x_nhwc, layer, *, negative_slope, out_dtype):
    """2-D conv via im2col + fused Pallas GEMM.  x_nhwc: (N, H, W, Cin) bf16."""
    cin_p = layer["cin_p"]
    if x_nhwc.shape[-1] != cin_p:
        # Pad input channels once (layer 1 only: 3 -> Kp/16) so the im2col K
        # dim is born lane-aligned -- no full (M, K) pad copy downstream.
        x_nhwc = jnp.pad(
            x_nhwc, ((0, 0), (0, 0), (0, 0), (0, cin_p - x_nhwc.shape[-1])))
    patches, (N, Ho, Wo) = _im2col_nhwc(x_nhwc, layer["kh"], layer["kw"],
                                        layer["stride"], pad=1)
    out = _fused_conv_gemm(patches, layer, negative_slope, out_dtype)
    return out.reshape(N, Ho, Wo, layer["cout"])


def _prepare_conv_layer(weight, bias, stride):
    """Pre-transpose / pad / cast the conv weight ONCE (not per forward call).

    weight: PyTorch layout (Cout, Cin, kh, kw); reordered to match the
    im2col (kh, kw, Cin_padded) flattening, zero-padded to (Kp, Cp), bf16.
    """
    cout, cin, kh, kw = weight.shape
    K = kh * kw * cin
    Kp = _round_up(K, LANE)
    cin_p = Kp // (kh * kw)            # Kp is a multiple of kh*kw (= 16)
    Cp = _round_up(cout, LANE)
    tk = _pick_tk(Kp)
    w = jnp.transpose(weight, (2, 3, 1, 0))            # (kh, kw, cin, cout)
    w = jnp.pad(w, ((0, 0), (0, 0), (0, cin_p - cin), (0, Cp - cout)))
    w2d = w.reshape(Kp, Cp).astype(jnp.bfloat16)
    b2d = jnp.pad(bias.reshape(1, cout),
                  ((0, 0), (0, Cp - cout))).astype(jnp.float32)
    return {"w2d": w2d, "b2d": b2d, "stride": stride, "kh": kh, "kw": kw,
            "cin": cin, "cin_p": cin_p, "cout": cout,
            "Kp": Kp, "Cp": Cp, "tk": tk}


def init_vqgan_discriminator_params(key, in_channels=3, base_channels=64):
    """Deterministic DCGAN-style init (N(0, 0.02) weights, zero bias)."""
    specs = [
        (in_channels,       base_channels,     2),
        (base_channels,     base_channels * 2, 2),
        (base_channels * 2, base_channels * 4, 2),
        (base_channels * 4, base_channels * 8, 1),
        (base_channels * 8, 1,                 1),
    ]
    params = []
    for cin, cout, stride in specs:
        key, wk = jax.random.split(key)
        w = 0.02 * jax.random.normal(wk, (cout, cin, 4, 4), jnp.float32)
        b = jnp.zeros((cout,), jnp.float32)
        params.append(_prepare_conv_layer(w, b, stride))
    return params


def vqgan_discriminator_forward(params, x_nchw):
    """x_nchw: (N, C, H, W) float32 -> (N, 1, H', W') float32 patch logits."""
    x = jnp.transpose(x_nchw, (0, 2, 3, 1)).astype(jnp.bfloat16)  # NCHW->NHWC
    n_layers = len(params)
    for i, layer in enumerate(params):
        last = i == n_layers - 1
        x = conv2d_pallas(
            x, layer,
            negative_slope=None if last else 0.2,      # last conv: no act
            out_dtype=jnp.float32 if last else jnp.bfloat16)
    return jnp.transpose(x, (0, 3, 1, 2))              # NHWC -> NCHW


def _reference_forward(params, x_nchw):
    """Pure-JAX mirror of the kernel numerics (bf16 activations, f32 accum)
    used as a correctness check."""
    x = jnp.transpose(x_nchw, (0, 2, 3, 1)).astype(jnp.bfloat16)
    n_layers = len(params)
    for i, layer in enumerate(params):
        last = i == n_layers - 1
        cin_p = layer["cin_p"]
        if x.shape[-1] != cin_p:
            x = jnp.pad(x, ((0, 0), (0, 0), (0, 0), (0, cin_p - x.shape[-1])))
        patches, (N, Ho, Wo) = _im2col_nhwc(x, layer["kh"], layer["kw"],
                                            layer["stride"], pad=1)
        w = layer["w2d"].astype(jnp.float32)[:, :layer["cout"]]
        b = layer["b2d"][:, :layer["cout"]]
        out = jnp.dot(patches.astype(jnp.float32), w,
                      precision=jax.lax.Precision.HIGHEST) + b
        if not last:
            out = jnp.where(out > 0, out, 0.2 * out)
        out_dtype = jnp.float32 if last else jnp.bfloat16
        x = out.reshape(N, Ho, Wo, layer["cout"]).astype(out_dtype)
    return jnp.transpose(x, (0, 3, 1, 2))


if __name__ == "__main__":
    key = jax.random.PRNGKey(0)
    pkey, xkey = jax.random.split(key)

    # Small synthetic config; base_channels=32 makes the final layer's
    # K = 16*256 = 4096 exercise the multi-K-step accumulator path too.
    in_channels, base_channels = 3, 32
    params = init_vqgan_discriminator_params(pkey, in_channels, base_channels)

    # batch=2, channels=3, spatial=32 (min spatial so the 5-layer PatchGAN fits)
    x = jax.random.normal(xkey, (2, in_channels, 32, 32), jnp.float32)

    logits = jax.block_until_ready(vqgan_discriminator_forward(params, x))

    assert logits.shape == (2, 1, 2, 2), logits.shape
    assert logits.dtype == jnp.float32
    assert bool(jnp.all(jnp.isfinite(logits)))

    ref = jax.block_until_ready(_reference_forward(params, x))
    err = float(jnp.max(jnp.abs(logits - ref)))
    tol = 1e-3 + 1e-2 * float(jnp.max(jnp.abs(ref)))
    assert err <= tol, (err, tol)

    print("KERNEL_OK")
</pallas_src>

<mosaic_0001>
module attributes {stable_mosaic.version = 11 : i64} {
  func.func @_conv_gemm_kernel_1k(%arg0: i32, %arg1: memref<256x128xbf16, #tpu.memory_space<vmem>>, %arg2: memref<128x128xbf16, #tpu.memory_space<vmem>>, %arg3: memref<1x128xf32, #tpu.memory_space<vmem>>, %arg4: memref<256x128xbf16, #tpu.memory_space<vmem>>) attributes {dimension_semantics = [#tpu.dimension_semantics<parallel>], iteration_bounds = array<i64: 2>, scalar_prefetch = 0 : i64, scratch_operands = 0 : i64, tpu.core_type = #tpu.core_type<tc>, window_params = [{transform_indices = @transform_0, window_bounds = array<i64: 256, 128>}, {pipeline_mode = #tpu.pipeline_mode<synchronous>, transform_indices = @transform_1, window_bounds = array<i64: 128, 128>}, {pipeline_mode = #tpu.pipeline_mode<synchronous>, transform_indices = @transform_2, window_bounds = array<i64: 1, 128>}, {transform_indices = @transform_3, window_bounds = array<i64: 256, 128>}]} {
    %c0 = arith.constant 0 : index
    %c0_0 = arith.constant 0 : index
    %0 = vector.load %arg1[%c0, %c0_0] : memref<256x128xbf16, #tpu.memory_space<vmem>>, vector<256x128xbf16>
    %c0_1 = arith.constant 0 : index
    %c0_2 = arith.constant 0 : index
    %1 = vector.load %arg2[%c0_1, %c0_2] : memref<128x128xbf16, #tpu.memory_space<vmem>>, vector<128x128xbf16>
    %cst = arith.constant dense<0.000000e+00> : vector<256x128xf32>
    %2 = tpu.matmul %0, %1, %cst {dimension_numbers = #tpu.dot_dimension_numbers<[1], [0], [0], [1], [0, 0, 1, 1], [], []>} : vector<256x128xbf16>, vector<128x128xbf16>, vector<256x128xf32> -> vector<256x128xf32>
    %c0_3 = arith.constant 0 : index
    %c0_4 = arith.constant 0 : index
    %3 = vector.load %arg3[%c0_3, %c0_4] : memref<1x128xf32, #tpu.memory_space<vmem>>, vector<1x128xf32>
    %4 = vector.broadcast %3 : vector<1x128xf32> to vector<256x128xf32>
    %5 = arith.addf %2, %4 : vector<256x128xf32>
    %cst_5 = arith.constant 0.000000e+00 : f32
    %6 = vector.broadcast %cst_5 : f32 to vector<256x128xf32>
    %7 = arith.cmpf ogt, %5, %6 : vector<256x128xf32>
    %cst_6 = arith.constant 2.000000e-01 : f32
    %8 = vector.broadcast %cst_6 : f32 to vector<256x128xf32>
    %9 = arith.mulf %5, %8 : vector<256x128xf32>
    %10 = arith.select %7, %5, %9 : vector<256x128xi1>, vector<256x128xf32>
    %11 = arith.truncf %10 : vector<256x128xf32> to vector<256x128xbf16>
    %c0_7 = arith.constant 0 : index
    %c0_8 = arith.constant 0 : index
    %12 = vector.load %arg4[%c0_7, %c0_8] : memref<256x128xbf16, #tpu.memory_space<vmem>>, vector<256x128xbf16>
    tpu.vector_store %arg4[%c0_7, %c0_8], %11 {strides = array<i32>} : memref<256x128xbf16, #tpu.memory_space<vmem>>, vector<256x128xbf16>,
    return
  }
  func.func @transform_0(%arg0: i32) -> (i32, i32) {
    %c0_i32 = arith.constant 0 : i32
    %c0_i32_0 = arith.constant 0 : i32
    return %arg0, %c0_i32 : i32, i32
  }
  func.func @transform_1(%arg0: i32) -> (i32, i32) {
    %c0_i32 = arith.constant 0 : i32
    %c0_i32_0 = arith.constant 0 : i32
    %c0_i32_1 = arith.constant 0 : i32
    return %c0_i32, %c0_i32_0 : i32, i32
  }
  func.func @transform_2(%arg0: i32) -> (i32, i32) {
    %c0_i32 = arith.constant 0 : i32
    %c0_i32_0 = arith.constant 0 : i32
    %c0_i32_1 = arith.constant 0 : i32
    return %c0_i32, %c0_i32_0 : i32, i32
  }
  func.func @transform_3(%arg0: i32) -> (i32, i32) {
    %c0_i32 = arith.constant 0 : i32
    %c0_i32_0 = arith.constant 0 : i32
    return %arg0, %c0_i32 : i32, i32
  }
}

</mosaic_0001>

<bundles_post_ra>
// kernel: tpu_custom_call.1
= control target key start
LH: loop header
LB: loop body
LE: loop exit
PB: predicated region body
PF: predicated region fallthrough
CT: control target
= control target key end

     0   :  { %8 = vsyncpa [#allocation3], 0  ;;  %s1743_s0 = inlined_call_operand.hbm [shape: bf16[512,128], index: 0, kind: input, shape index: {}]   ;;  %s1744_s1 = inlined_call_operand.hbm [shape: bf16[128,128], index: 1, kind: input, shape index: {}]   ;;  %s1745_s2 = inlined_call_operand.vmem [shape: f32[1,128], index: 2, kind: input, shape index: {}]   ;;  %s1746_s3 = inlined_call_operand.hbm [shape: bf16[512,128], index: 3, kind: output, shape index: {}]  }
   0x1   :  { %10 = vsyncpa [#allocation3 + $0x1], 0 }
   0x2   :  { %11 = vsyncpa [#allocation6], 0 }
   0x3   :  { %12 = vsyncpa [#allocation4], 0 }
   0x4   :  { %14 = vsyncpa [#allocation4 + $0x1], 0  ;;  %s1452_s12 = smov 0   ;;  %s1454_s13 = smov 0  }
   0x5   :  { %s1456_s14 = smov 0   ;;  %s1458_s15 = smov 0  }
   0x6 LB: > { %s1473_s16 = sadd.s32 4294967295, %s1423_s15   ;;  %s920_s17 = sadd.s32 4294967294, %s1423_s15   ;;  %s1423_s15 = sphi %s1458_s15, %s1766_s15   ;;  %s1419_s14 = sphi %s1456_s14, %s1765_s14   ;;  %s1415_s13 = sphi %s1454_s13, %s1764_s13   ;;  %s1411_s12 = sphi %s1452_s12, %s1763_s12  }
   0x7   : > { %p40_p0 = scmp.ne.s32.totalorder %s1415_s13, %s1411_s12  ;;  %p1747_p1 = scmp.eq.s32.totalorder %s1473_s16, 0 }
   0x8   : > { %p112_p3 = scmp.eq.s32.totalorder %s920_s17, 1  ;;  %p921_p5 = scmp.ge.s32.totalorder %s1423_s15, 1 }
   0x9   : > { %p1482_p4 = por %p1747_p1, %p40_p0  ;;  %p119_p7 = scmp.lt.s32.totalorder %s1423_s15, 3 }
   0xa   : > { %p1487_p6 = por %p112_p3, %p40_p0  ;;  %s1425_s21 = smov [#allocation5]  }
   0xb   : > { %s1750_s18 = scalar_select %p1482_p4, 1, 0 }
   0xc   : > { %s1751_s19 = scalar_select %p1487_p6, 1, 0 }
   0xd   : > { %p1492_p8 = pnand %p921_p5, %p119_p7  ;;  %s131_s22 = sshll.u32 %s1425_s21, 4  ;;  %s1496_s22 = int_to_ptr.vmem [resolvable:$true] %s131_s22 }
   0xe   : > { %s1508_s24 = sadd.s32 1, %s1423_s15   ;;  %s27_s25 = sadd.s32 1, %s1419_s14 }
   0xf   : > { %s1752_s20 = scalar_select %p1492_p8, 1, 0 }
  0x10   : > { %p1218_p9 = pneg %p1492_p8  ;;  %s24_s26 = ssub.s32 %s1423_s15, %s1508_s24 }
  0x11   : > { %s1295_s29 = scalar_lea.hbm %s1744_s1, 1024 }
  0x12   : > { %p1503_p11 = pnand %p1218_p9, %p1747_p1  ;;  %p1296_p12 = scmp.ne.s32.totalorder %s1744_s1, %s1295_s29 }
  0x13   : > { %p1302_p5 = scmp.lt.u32.totalorder %s1295_s29, %s1744_s1 }
  0x14   : > { %p1297_p13 = pneg %p1503_p11 }
  0x16   : > { %p1298_p0 = pnand %p1297_p13, %p1296_p12 }
  0x18   : > { %p1299_p3 = pneg %p1298_p0 }
  0x1a   : > { %p1304_p7 = pnand %p1302_p5, %p1299_p3 }
  0x1c   : > { %1307 = shalt.err (!%p1304_p7)
}
  0x1d   : > { %s1308_s7 = scalar_lea.vmem %s1496_s22, 1024  ;;  %p1316_p2 = scmp.lt.s32.totalorder %s1496_s22, %s1496_s22 }
  0x1e   : > { %p1309_p9 = scmp.ne.s32.totalorder %s1496_s22, %s1308_s7  ;;  %p1317_p6 = scmp.lt.s32.totalorder %s1308_s7, %s1308_s7 }
  0x20   : > { %p1311_p10 = pnand %p1309_p9, %p1297_p13  ;;  %p1318_p4 = por %p1317_p6, %p1316_p2 }
  0x22   : > { %p1312_p1 = pneg %p1311_p10 }
  0x24   : > { %p1319_p8 = pnand %p1318_p4, %p1312_p1 }
  0x26   : > { %1322 = shalt.err (!%p1319_p8)
}
  0x27   : > { %s1426_s8 = smov 64   ;;  %s1427_s9 = smov 4  }
  0x28   : > { %1221 = dma.hbm_to_vmem [thread:$0]  (!%p1503_p11), %s1744_s1, 1024, %s1496_s22, [#allocation6], %s1426_s8, %s1426_s8, %s1427_s9  }
  0x29   : > { %p25_p1 = scmp.eq.s32.totalorder %s24_s26, 0  ;;  %p34_p2 = scmp.ne.s32.totalorder %s1419_s14, %s1415_s13 }
  0x2a   : > { %p35_p4 = scmp.eq.s32.totalorder %s1423_s15, 0  ;;  %p1231_p6 = scmp.lt.s32.totalorder %s1423_s15, 2 }
  0x2b   : > { %s1542_s17 = scalar_select %p25_p1, %s1419_s14, %s27_s25  }
  0x2c   : > { %p36_p8 = por %p35_p4, %p34_p2  ;;  %p1754_p10 = scmp.eq.s32.totalorder %s1473_s16, 1 }
  0x2d   : > { %s148_s23 = sand.u32 1, %s1419_s14   ;;  %s993_s27 = sshll.u32 %s1423_s15, 11 }
  0x2e   : > { %p1546_p12 = por %p1754_p10, %p34_p2  ;;  %s924_s28 = sshll.u32 %s148_s23, 7 }
  0x2f   : > { %s1555_s4 = scalar_lea.hbm %s1743_s0, %s993_s27  ;;  %s152_s22 = scalar_lea.vmem [#allocation2], %s924_s28 }
  0x30   : > { %s159_s25 = sshll.u32 %s152_s22, 4  ;;  %p1557_p11 = pnand %p1231_p6, %p36_p8  ;;  %s1561_s25 = int_to_ptr.vmem [resolvable:$true] %s159_s25 }
  0x31   : > { %s1563_s5 = scalar_lea.sflag [#allocation3], %s148_s23  ;;  %s1323_s6 = scalar_lea.hbm %s1555_s4, 2048 }
  0x32   : > { %p1324_p13 = scmp.ne.s32.totalorder %s1555_s4, %s1323_s6  ;;  %p1325_p0 = pneg %p1557_p11 }
  0x33   : > { %s1328_s11 = scalar_lea.hbm %s1743_s0, 4096  ;;  %p1329_p7 = scmp.lt.u32.totalorder %s1555_s4, %s1743_s0 }
  0x34   : > { %p1326_p3 = pnand %p1325_p0, %p1324_p13  ;;  %p1330_p9 = scmp.lt.u32.totalorder %s1328_s11, %s1323_s6 }
  0x35   : > { %p1332_p2 = scmp.lt.u32.totalorder %s1323_s6, %s1555_s4 }
  0x36   : > { %p1327_p5 = pneg %p1326_p3  ;;  %p1331_p1 = por %p1330_p9, %p1329_p7 }
  0x38   : > { %p1333_p4 = por %p1332_p2, %p1331_p1 }
  0x3a   : > { %p1334_p6 = pnand %p1333_p4, %p1327_p5 }
  0x3c   : > { %1337 = shalt.err (!%p1334_p6)
}
  0x3d   : > { %s1338_s23 = scalar_lea.vmem %s1561_s25, 2048  ;;  %s1428_s29 = smov [#allocation2]  }
  0x3e   : > { %p1339_p8 = scmp.ne.s32.totalorder %s1561_s25, %s1338_s23  ;;  %s1343_s30 = sshll.u32 %s1428_s29, 4  ;;  %s1344_s30 = int_to_ptr.vmem [resolvable:$false] %s1343_s30 }
  0x3f   : > { %s1345_s22 = scalar_lea.vmem %s1344_s30, 4096  ;;  %p1346_p3 = scmp.lt.s32.totalorder %s1561_s25, %s1344_s30 }
  0x40   : > { %p1341_p10 = pnand %p1339_p8, %p1325_p0  ;;  %p1347_p7 = scmp.lt.s32.totalorder %s1345_s22, %s1338_s23 }
  0x42   : > { %p1342_p13 = pneg %p1341_p10  ;;  %p1348_p9 = por %p1347_p7, %p1346_p3 }
  0x44   : > { %p1349_p1 = pnand %p1348_p9, %p1342_p13 }
  0x46   : > { %1352 = shalt.err (!%p1349_p1)
}
  0x47   : > { %1225 = dma.hbm_to_vmem [thread:$0]  (!%p1557_p11), %s1555_s4, 2048, %s1561_s25, %s1563_s5, %s1426_s8, %s1426_s8, %s1427_s9  }
  0x48   : > { %p1757_p0 = scmp.ne.s32.totalorder %s1752_s20, 0 }
  0x49   : > { %s1597_s6 = sand.u32 (!%p1757_p0), 1, %s1415_s13   ;;  %p1758_p5 = scmp.ne.s32.totalorder (!%p1757_p0), %s1750_s18, 0 }
  0x4a   : > { %171 = sbr.rel (%p1757_p0) target bundleno = 387 (0x183), region = 32  ;;  %s928_s7 = sshll.u32 (!%p1757_p0), %s1597_s6, 7 }
  0x4b   : > { %s174_s10 = scalar_lea.sflag (!%p1757_p0), [#allocation3], %s1597_s6  ;;  %s1603_s26 = scalar_lea.vmem (!%p1757_p0), [#allocation2], %s928_s7 }
  0x51   : > { %1398 = dma.done.wait (%p1758_p5), %s174_s10, 2048  }
  0x52   : > { %1400 = vsyncadd (%p1758_p5), %s174_s10, 4294965248  ;;  %p1759_p11 = scmp.eq.s32.totalorder %s1473_s16, 0 }
  0x54   : > { %1402 = dma.done.wait (%p1759_p11), [#allocation6], 1024   ;;  %p1760_p2 = pmov %p1759_p11 }
  0x55   : > { %v1271_v0 = vld [vmem:[#allocation5] sm:$0xff]   ;;  %v1272_v1 = vld [vmem:[#allocation5 + $0x8] sm:$0xff]   ;;  %v1273_v2 = vld [vmem:[#allocation5 + $0x10] sm:$0xff]   ;;  %s1648_s8 = scalar_lea.vmem [#allocation7], %s928_s7  ;;  %s1026_s9 = sshll.u32 %s1473_s16, 11 }
  0x56   : > { %1404 = vsyncadd (%p1760_p2), [#allocation6], 4294966272  ;;  %1146 = vmatprep.subr.bf16.mxu0 %v1271_v0  ;;  %1194 = vmatprep.subr.bf16.mxu1 %v1271_v0  ;;  %v1274_v3 = vld [vmem:[#allocation5 + $0x18] sm:$0xff]   ;;  %v1279_v4 = vld [vmem:[%s1603_s26] sm:$0xff]   ;;  %s837_s4 = sshll.u32 %s1648_s8, 4  ;;  %s1696_s11 = scalar_lea.hbm %s1746_s3, %s1026_s9  ;;  %s1698_s4 = int_to_ptr.vmem [resolvable:$true] %s837_s4 }
  0x57   : > { %1147 = vmatpush3.bf16.msra.mxu0 %v1271_v0  ;;  %1202 = vmatpush3.bf16.msra.mxu1 %v1271_v0  ;;  %v1280_v5 = vld [vmem:[%s1603_s26 + $0x40] sm:$0xff]   ;;  %v1276_v7 = vld [vmem:[#allocation5 + $0x28] sm:$0xff]   ;;  %v1277_v8 = vld [vmem:[#allocation5 + $0x30] sm:$0xff]   ;;  %s824_s16 = scalar_lea.sflag [#allocation4], %s1597_s6  ;;  %s1353_s27 = scalar_lea.vmem %s1698_s4, 2048 }
  0x58   : > { %1148 = vmatprep.subr.bf16.mxu0 %v1272_v1  ;;  %1195 = vmatprep.subr.bf16.mxu1 %v1272_v1  ;;  %v1275_v6 = vld [vmem:[#allocation5 + $0x20] sm:$0xff]   ;;  %v1278_v9 = vld [vmem:[#allocation5 + $0x38] sm:$0xff]   ;;  %v1281_v10 = vld [vmem:[%s1603_s26 + $0x8] sm:$0xff]   ;;  %p1354_p4 = scmp.ne.s32.totalorder %s1698_s4, %s1353_s27  ;;  %s1429_s28 = smov [#allocation7]  }
  0x59   : > { %1162 = vmatprep.mubr.bf16.mxu0 %v1279_v4  ;;  %1178 = vmatprep.mubr.bf16.mxu1 %v1280_v5  ;;  %v1282_v11 = vld [vmem:[%s1603_s26 + $0x48] sm:$0xff]   ;;  %v1283_v12 = vld [vmem:[%s1603_s26 + $0x10] sm:$0xff]   ;;  %v1285_v14 = vld [vmem:[%s1603_s26 + $0x18] sm:$0xff]   ;;  %s1357_s23 = sshll.u32 %s1429_s28, 4  ;;  %s1358_s23 = int_to_ptr.vmem [resolvable:$false] %s1357_s23 }
  0x5a   : > { %v1284_v13 = vld [vmem:[%s1603_s26 + $0x50] sm:$0xff]   ;;  %v1286_v15 = vld [vmem:[%s1603_s26 + $0x58] sm:$0xff]   ;;  %v1287_v16 = vld [vmem:[%s1603_s26 + $0x20] sm:$0xff]   ;;  %p1355_p6 = pnand %p1354_p4, %p1546_p12  ;;  %s1359_s29 = scalar_lea.vmem %s1358_s23, 4096 }
  0x5b   : > { %1149 = vmatpush3.bf16.msra.mxu0 %v1272_v1  ;;  %1203 = vmatpush3.bf16.msra.mxu1 %v1272_v1  ;;  %v1288_v17 = vld [vmem:[%s1603_s26 + $0x60] sm:$0xff]   ;;  %v1289_v18 = vld [vmem:[%s1603_s26 + $0x28] sm:$0xff]   ;;  %v1291_v20 = vld [vmem:[%s1603_s26 + $0x30] sm:$0xff]   ;;  %p1360_p10 = scmp.lt.s32.totalorder %s1698_s4, %s1358_s23  ;;  %p1361_p13 = scmp.lt.s32.totalorder %s1359_s29, %s1353_s27 }
  0x5c   : > { %1150 = vmatprep.subr.bf16.mxu0 %v1273_v2  ;;  %1196 = vmatprep.subr.bf16.mxu1 %v1273_v2  ;;  %v1290_v19 = vld [vmem:[%s1603_s26 + $0x68] sm:$0xff]   ;;  %v1292_v21 = vld [vmem:[%s1603_s26 + $0x70] sm:$0xff]   ;;  %v1293_v22 = vld [vmem:[%s1603_s26 + $0x38] sm:$0xff]   ;;  %p1356_p8 = pneg %p1355_p6 }
  0x5d   : > { %v1294_v23 = vld [vmem:[%s1603_s26 + $0x78] sm:$0xff]   ;;  %v1632_v24 = vld [vmem:[%s1745_s2] ss:$0 sm:$0xff]  ;;  %p1362_p3 = por %p1361_p13, %p1360_p10 }
  0x5f   : > { %1151 = vmatpush3.bf16.msra.mxu0 %v1273_v2  ;;  %1204 = vmatpush3.bf16.msra.mxu1 %v1273_v2  ;;  %p1363_p7 = pnand %p1362_p3, %p1356_p8 }
  0x60   : > { %1152 = vmatprep.subr.bf16.mxu0 %v1274_v3  ;;  %1197 = vmatprep.subr.bf16.mxu1 %v1274_v3 }
  0x63   : > { %1153 = vmatpush3.bf16.msra.mxu0 %v1274_v3  ;;  %1205 = vmatpush3.bf16.msra.mxu1 %v1274_v3 }
  0x64   : > { %1154 = vmatprep.subr.bf16.mxu0 %v1275_v6  ;;  %1198 = vmatprep.subr.bf16.mxu1 %v1275_v6 }
  0x67   : > { %1155 = vmatpush3.bf16.msra.mxu0 %v1275_v6  ;;  %1206 = vmatpush3.bf16.msra.mxu1 %v1275_v6 }
  0x68   : > { %1156 = vmatprep.subr.bf16.mxu0 %v1276_v7  ;;  %1199 = vmatprep.subr.bf16.mxu1 %v1276_v7 }
  0x6b   : > { %1157 = vmatpush3.bf16.msra.mxu0 %v1276_v7  ;;  %1207 = vmatpush3.bf16.msra.mxu1 %v1276_v7 }
  0x6c   : > { %1158 = vmatprep.subr.bf16.mxu0 %v1277_v8  ;;  %1200 = vmatprep.subr.bf16.mxu1 %v1277_v8 }
  0x6f   : > { %1159 = vmatpush3.bf16.msra.mxu0 %v1277_v8  ;;  %1208 = vmatpush3.bf16.msra.mxu1 %v1277_v8 }
  0x70   : > { %1160 = vmatprep.subr.bf16.mxu0 %v1278_v9  ;;  %1201 = vmatprep.subr.bf16.mxu1 %v1278_v9 }
  0x73   : > { %1161 = vmatpush3.bf16.msra.mxu0 %v1278_v9  ;;  %1209 = vmatpush3.bf16.msra.mxu1 %v1278_v9 }
  0x76   : > { %1163 = vmatmul.mubr.bf16.vlgmr.msra.gmra.mrb[0].mxu0 %v1281_v10  ;;  %1179 = vmatmul.mubr.bf16.vlgmr.msra.gmra.mrb[0].mxu1 %v1282_v11 }
  0x77   : > { %1166 = vmatprep.mubr.bf16.mxu0 %v1283_v12  ;;  %1182 = vmatprep.mubr.bf16.mxu1 %v1284_v13 }
  0x7e   : > { %1167 = vmatmul.mubr.bf16.gmra.mrb[4].mxu0 %v1285_v14  ;;  %1183 = vmatmul.mubr.bf16.gmra.mrb[4].mxu1 %v1286_v15 }
  0x7f   : > { %1170 = vmatprep.mubr.bf16.mxu0 %v1287_v16  ;;  %1186 = vmatprep.mubr.bf16.mxu1 %v1288_v17 }
  0x86   : > { %1171 = vmatmul.mubr.bf16.gmra.mrb[8].mxu0 %v1289_v18  ;;  %1187 = vmatmul.mubr.bf16.gmra.mrb[8].mxu1 %v1290_v19 }
  0x87   : > { %1174 = vmatprep.mubr.bf16.mxu0 %v1291_v20  ;;  %1190 = vmatprep.mubr.bf16.mxu1 %v1292_v21 }
  0x8e   : > { %1175 = vmatmul.mubr.bf16.gmra.mrb[12].mxu0 %v1293_v22  ;;  %1191 = vmatmul.mubr.bf16.gmra.mrb[12].mxu1 %v1294_v23 }
 0x149   : > { %v1164_v25 = vpop.f32.mrb[0].mxu0  ;;  %v1180_v26 = vpop.f32.mrb[0].mxu1 }
 0x14a   : > { %v449_v27 = vadd.f32 %v1164_v25, %v1632_v24  ;;  %v513_v28 = vadd.f32 %v1180_v26, %v1632_v24  ;;  %v440_v29 = vpop.f32.mrb[1].mxu0  ;;  %v504_v30 = vpop.f32.mrb[1].mxu1 }
 0x14b   : > { %v441_v31 = vadd.f32 %v1632_v24, %v440_v29  ;;  %v505_v32 = vadd.f32 %v1632_v24, %v504_v30  ;;  %v1165_v33 = vpop.f32.mrb[2].mxu0  ;;  %v1181_v34 = vpop.f32.mrb[2].mxu1 }
 0x14c   : > { %vm569_vm0 = vcmp.gt.f32.partialorder %v449_v27, 0.0  ;;  %v601_v35 = vmul.f32 0.2, %v449_v27  ;;  %vm585_vm1 = vcmp.gt.f32.partialorder %v513_v28, 0.0  ;;  %v617_v36 = vmul.f32 0.2, %v513_v28 }
 0x14d   : > { %vm567_vm2 = vcmp.gt.f32.partialorder %v441_v31, 0.0  ;;  %v599_v37 = vmul.f32 0.2, %v441_v31  ;;  %vm583_vm3 = vcmp.gt.f32.partialorder %v505_v32, 0.0  ;;  %v615_v38 = vmul.f32 0.2, %v505_v32 }
 0x14e   : > { %v452_v39 = vadd.f32 %v1165_v33, %v1632_v24  ;;  %v516_v40 = vadd.f32 %v1181_v34, %v1632_v24  ;;  %v443_v41 = vpop.f32.mrb[3].mxu0  ;;  %v507_v42 = vpop.f32.mrb[3].mxu1  ;;  %v633_v43 = vsel %vm569_vm0, %v449_v27, %v601_v35  ;;  %v649_v44 = vsel %vm585_vm1, %v513_v28, %v617_v36 }
 0x14f   : > { %v444_v45 = vadd.f32 %v1632_v24, %v443_v41  ;;  %v508_v46 = vadd.f32 %v1632_v24, %v507_v42  ;;  %v631_v51 = vsel %vm567_vm2, %v441_v31, %v599_v37  ;;  %v647_v52 = vsel %vm583_vm3, %v505_v32, %v615_v38 }
 0x150   : > { %vm570_vm4 = vcmp.gt.f32.partialorder %v452_v39, 0.0  ;;  %v602_v47 = vmul.f32 0.2, %v452_v39  ;;  %vm586_vm5 = vcmp.gt.f32.partialorder %v516_v40, 0.0  ;;  %v618_v48 = vmul.f32 0.2, %v516_v40 }
 0x151   : > { %vm568_vm6 = vcmp.gt.f32.partialorder %v444_v45, 0.0  ;;  %v600_v49 = vmul.f32 0.2, %v444_v45  ;;  %vm584_vm7 = vcmp.gt.f32.partialorder %v508_v46, 0.0  ;;  %v616_v50 = vmul.f32 0.2, %v508_v46 }
 0x152   : > { %v634_v53 = vsel %vm570_vm4, %v452_v39, %v602_v47  ;;  %v650_v54 = vsel %vm586_vm5, %v516_v40, %v618_v48  ;;  %v1168_v55 = vpop.f32.mrb[4].mxu0  ;;  %v1184_v56 = vpop.f32.mrb[4].mxu1 }
 0x153   : > { %v1035_v57 = vpack.c.bf16 %v634_v53, %v633_v43  ;;  %v1075_v58 = vpack.c.bf16 %v650_v54, %v649_v44  ;;  %v632_v59 = vsel %vm568_vm6, %v444_v45, %v600_v49  ;;  %v648_v60 = vsel %vm584_vm7, %v508_v46, %v616_v50  ;;  %v456_v61 = vpop.f32.mrb[5].mxu0  ;;  %v520_v62 = vpop.f32.mrb[5].mxu1 }
 0x154   : > { %v1030_v63 = vpack.c.bf16 %v632_v59, %v631_v51  ;;  %v1070_v0 = vpack.c.bf16 %v648_v60, %v647_v52  ;;  %v465_v1 = vadd.f32 %v1168_v55, %v1632_v24  ;;  %v529_v2 = vadd.f32 %v1184_v56, %v1632_v24  ;;  %v1169_v3 = vpop.f32.mrb[6].mxu0  ;;  %v1185_v4 = vpop.f32.mrb[6].mxu1 }
 0x155   : > { %1107 = vst [vmem:[%s1648_s8 + $0x8] sm:$0xff] %v1035_v57   ;;  %1115 = vst [vmem:[%s1648_s8 + $0x48] sm:$0xff] %v1075_v58   ;;  %v457_v5 = vadd.f32 %v1632_v24, %v456_v61  ;;  %v521_v6 = vadd.f32 %v1632_v24, %v520_v62  ;;  %v468_v7 = vadd.f32 %v1169_v3, %v1632_v24  ;;  %v459_v9 = vpop.f32.mrb[7].mxu0  ;;  %v523_v10 = vpop.f32.mrb[7].mxu1 }
 0x156   : > { %v532_v8 = vadd.f32 %v1185_v4, %v1632_v24  ;;  %1031 = vst [vmem:[%s1648_s8] sm:$0xff] %v1030_v63   ;;  %1114 = vst [vmem:[%s1648_s8 + $0x40] sm:$0xff] %v1070_v0   ;;  %vm573_vm8 = vcmp.gt.f32.partialorder %v465_v1, 0.0  ;;  %v605_v11 = vmul.f32 0.2, %v465_v1  ;;  %vm589_vm9 = vcmp.gt.f32.partialorder %v529_v2, 0.0 }
 0x157   : > { %v621_v12 = vmul.f32 0.2, %v529_v2  ;;  %vm571_vm10 = vcmp.gt.f32.partialorder %v457_v5, 0.0  ;;  %v603_v13 = vmul.f32 0.2, %v457_v5  ;;  %vm587_vm11 = vcmp.gt.f32.partialorder %v521_v6, 0.0 }
 0x158   : > { %v637_v14 = vsel %vm573_vm8, %v465_v1, %v605_v11  ;;  %v619_v15 = vmul.f32 0.2, %v521_v6  ;;  %vm574_vm12 = vcmp.gt.f32.partialorder %v468_v7, 0.0  ;;  %v606_v16 = vmul.f32 0.2, %v468_v7 }
 0x159   : > { %v653_v17 = vsel %vm589_vm9, %v529_v2, %v621_v12  ;;  %v635_v18 = vsel %vm571_vm10, %v457_v5, %v603_v13  ;;  %vm590_vm13 = vcmp.gt.f32.partialorder %v532_v8, 0.0  ;;  %v622_v19 = vmul.f32 0.2, %v532_v8  ;;  %v1172_v20 = vpop.f32.mrb[8].mxu0  ;;  %v1188_v21 = vpop.f32.mrb[8].mxu1 }
 0x15a   : > { %v638_v22 = vsel %vm574_vm12, %v468_v7, %v606_v16  ;;  %v460_v23 = vadd.f32 %v1632_v24, %v459_v9  ;;  %v524_v25 = vadd.f32 %v1632_v24, %v523_v10  ;;  %v481_v26 = vadd.f32 %v1172_v20, %v1632_v24  ;;  %v472_v27 = vpop.f32.mrb[9].mxu0  ;;  %v536_v28 = vpop.f32.mrb[9].mxu1 }
 0x15b   : > { %v1045_v29 = vpack.c.bf16 %v638_v22, %v637_v14  ;;  %v654_v30 = vsel %vm590_vm13, %v532_v8, %v622_v19  ;;  %v545_v31 = vadd.f32 %v1188_v21, %v1632_v24  ;;  %v473_v32 = vadd.f32 %v1632_v24, %v472_v27  ;;  %v1173_v33 = vpop.f32.mrb[10].mxu0  ;;  %v1189_v34 = vpop.f32.mrb[10].mxu1 }
 0x15c   : > { %v1085_v35 = vpack.c.bf16 %v654_v30, %v653_v17  ;;  %vm572_vm14 = vcmp.gt.f32.partialorder %v460_v23, 0.0  ;;  %v604_v36 = vmul.f32 0.2, %v460_v23  ;;  %vm588_vm15 = vcmp.gt.f32.partialorder %v524_v25, 0.0  ;;  %v475_v37 = vpop.f32.mrb[11].mxu0  ;;  %v539_v38 = vpop.f32.mrb[11].mxu1 }
 0x15d   : > { %1109 = vst [vmem:[%s1648_s8 + $0x18] sm:$0xff] %v1045_v29   ;;  %v620_v39 = vmul.f32 0.2, %v524_v25  ;;  %vm577_vm0 = vcmp.gt.f32.partialorder %v481_v26, 0.0  ;;  %v609_v40 = vmul.f32 0.2, %v481_v26  ;;  %v651_v41 = vsel %vm587_vm11, %v521_v6, %v619_v15 }
 0x15e   : > { %vm593_vm1 = vcmp.gt.f32.partialorder %v545_v31, 0.0  ;;  %1117 = vst [vmem:[%s1648_s8 + $0x58] sm:$0xff] %v1085_v35   ;;  %v636_v42 = vsel %vm572_vm14, %v460_v23, %v604_v36  ;;  %v625_v43 = vmul.f32 0.2, %v545_v31  ;;  %vm575_vm2 = vcmp.gt.f32.partialorder %v473_v32, 0.0 }
 0x15f   : > { %v1040_v44 = vpack.c.bf16 %v636_v42, %v635_v18  ;;  %v652_v45 = vsel %vm588_vm15, %v524_v25, %v620_v39  ;;  %v607_v46 = vmul.f32 0.2, %v473_v32  ;;  %v537_v47 = vadd.f32 %v1632_v24, %v536_v28 }
 0x160   : > { %v1080_v48 = vpack.c.bf16 %v652_v45, %v651_v41  ;;  %v641_v49 = vsel %vm577_vm0, %v481_v26, %v609_v40  ;;  %v657_v50 = vsel %vm593_vm1, %v545_v31, %v625_v43  ;;  %v484_v51 = vadd.f32 %v1173_v33, %v1632_v24 }
 0x161   : > { %1108 = vst [vmem:[%s1648_s8 + $0x10] sm:$0xff] %v1040_v44   ;;  %vm591_vm3 = vcmp.gt.f32.partialorder %v537_v47, 0.0  ;;  %v623_v52 = vmul.f32 0.2, %v537_v47  ;;  %v548_v53 = vadd.f32 %v1189_v34, %v1632_v24  ;;  %v476_v54 = vadd.f32 %v1632_v24, %v475_v37  ;;  %v1176_v55 = vpop.f32.mrb[12].mxu0  ;;  %v1192_v56 = vpop.f32.mrb[12].mxu1 }
 0x162   : > { %1116 = vst [vmem:[%s1648_s8 + $0x50] sm:$0xff] %v1080_v48   ;;  %vm578_vm4 = vcmp.gt.f32.partialorder %v484_v51, 0.0  ;;  %v610_v57 = vmul.f32 0.2, %v484_v51  ;;  %v540_v58 = vadd.f32 %v1632_v24, %v539_v38  ;;  %v497_v59 = vadd.f32 %v1176_v55, %v1632_v24  ;;  %v488_v60 = vpop.f32.mrb[13].mxu0  ;;  %v552_v61 = vpop.f32.mrb[13].mxu1 }
 0x163   : > { %v639_v62 = vsel %vm575_vm2, %v473_v32, %v607_v46  ;;  %vm594_vm5 = vcmp.gt.f32.partialorder %v548_v53, 0.0  ;;  %v626_v63 = vmul.f32 0.2, %v548_v53  ;;  %vm576_vm6 = vcmp.gt.f32.partialorder %v476_v54, 0.0  ;;  %v1177_v0 = vpop.f32.mrb[14].mxu0  ;;  %v1193_v1 = vpop.f32.mrb[14].mxu1 }
 0x164   : > { %v642_v2 = vsel %vm578_vm4, %v484_v51, %v610_v57  ;;  %v608_v3 = vmul.f32 0.2, %v476_v54  ;;  %vm592_vm7 = vcmp.gt.f32.partialorder %v540_v58, 0.0  ;;  %v624_v4 = vmul.f32 0.2, %v540_v58  ;;  %v491_v5 = vpop.f32.mrb[15].mxu0 }
 0x165   : > { %v655_v6 = vsel %vm591_vm3, %v537_v47, %v623_v52  ;;  %v1055_v7 = vpack.c.bf16 %v642_v2, %v641_v49  ;;  %v658_v8 = vsel %vm594_vm5, %v548_v53, %v626_v63  ;;  %v613_v9 = vmul.f32 0.2, %v497_v59  ;;  %v555_v10 = vpop.f32.mrb[15].mxu1 }
 0x166   : > { %v1095_v11 = vpack.c.bf16 %v658_v8, %v657_v50  ;;  %v640_v12 = vsel %vm576_vm6, %v476_v54, %v608_v3  ;;  %v656_v13 = vsel %vm592_vm7, %v540_v58, %v624_v4  ;;  %v561_v14 = vadd.f32 %v1192_v56, %v1632_v24 }
 0x167   : > { %1111 = vst [vmem:[%s1648_s8 + $0x28] sm:$0xff] %v1055_v7   ;;  %v1050_v15 = vpack.c.bf16 %v640_v12, %v639_v62  ;;  %v1090_v16 = vpack.c.bf16 %v656_v13, %v655_v6  ;;  %vm581_vm8 = vcmp.gt.f32.partialorder %v497_v59, 0.0  ;;  %v489_v17 = vadd.f32 %v1632_v24, %v488_v60 }
 0x168   : > { %1119 = vst [vmem:[%s1648_s8 + $0x68] sm:$0xff] %v1095_v11   ;;  %vm597_vm9 = vcmp.gt.f32.partialorder %v561_v14, 0.0  ;;  %v629_v18 = vmul.f32 0.2, %v561_v14  ;;  %v553_v19 = vadd.f32 %v1632_v24, %v552_v61  ;;  %v500_v20 = vadd.f32 %v1177_v0, %v1632_v24 }
 0x169   : > { %1110 = vst [vmem:[%s1648_s8 + $0x20] sm:$0xff] %v1050_v15   ;;  %1118 = vst [vmem:[%s1648_s8 + $0x60] sm:$0xff] %v1090_v16   ;;  %v611_v21 = vmul.f32 0.2, %v489_v17  ;;  %v564_v22 = vadd.f32 %v1193_v1, %v1632_v24  ;;  %v492_v23 = vadd.f32 %v1632_v24, %v491_v5  ;;  %v645_v25 = vsel %vm581_vm8, %v497_v59, %v613_v9 }
 0x16a   : > { %vm579_vm10 = vcmp.gt.f32.partialorder %v489_v17, 0.0  ;;  %vm582_vm11 = vcmp.gt.f32.partialorder %v500_v20, 0.0  ;;  %v661_v26 = vsel %vm597_vm9, %v561_v14, %v629_v18  ;;  %v614_v27 = vmul.f32 0.2, %v500_v20 }
 0x16b   : > { %vm598_vm12 = vcmp.gt.f32.partialorder %v564_v22, 0.0  ;;  %v630_v28 = vmul.f32 0.2, %v564_v22  ;;  %vm595_vm13 = vcmp.gt.f32.partialorder %v553_v19, 0.0  ;;  %vm580_vm14 = vcmp.gt.f32.partialorder %v492_v23, 0.0 }
 0x16c   : > { %v612_v29 = vmul.f32 0.2, %v492_v23  ;;  %v556_v30 = vadd.f32 %v1632_v24, %v555_v10  ;;  %v643_v31 = vsel %vm579_vm10, %v489_v17, %v611_v21  ;;  %v627_v32 = vmul.f32 0.2, %v553_v19 }
 0x16d   : > { %v646_v33 = vsel %vm582_vm11, %v500_v20, %v614_v27  ;;  %v662_v34 = vsel %vm598_vm12, %v564_v22, %v630_v28 }
 0x16e   : > { %v1065_v35 = vpack.c.bf16 %v646_v33, %v645_v25  ;;  %v1105_v36 = vpack.c.bf16 %v662_v34, %v661_v26  ;;  %v644_v37 = vsel %vm580_vm14, %v492_v23, %v612_v29  ;;  %vm596_vm15 = vcmp.gt.f32.partialorder %v556_v30, 0.0 }
 0x16f   : > { %v1060_v38 = vpack.c.bf16 %v644_v37, %v643_v31  ;;  %v628_v39 = vmul.f32 0.2, %v556_v30  ;;  %v659_v24 = vsel %vm595_vm13, %v553_v19, %v627_v32 }
 0x170   : > { %1113 = vst [vmem:[%s1648_s8 + $0x38] sm:$0xff] %v1065_v35   ;;  %1121 = vst [vmem:[%s1648_s8 + $0x78] sm:$0xff] %v1105_v36  }
 0x171   : > { %1112 = vst [vmem:[%s1648_s8 + $0x30] sm:$0xff] %v1060_v38   ;;  %v660_v40 = vsel %vm596_vm15, %v556_v30, %v628_v39 }
 0x172   : > { %v1100_v41 = vpack.c.bf16 %v660_v40, %v659_v24 }
 0x174   : > { %1120 = vst [vmem:[%s1648_s8 + $0x70] sm:$0xff] %v1100_v41  }
 0x175   : > { %1366 = shalt.err (!%p1363_p7)
}
 0x176   : > { %s1367_s30 = scalar_lea.hbm %s1696_s11, 2048  ;;  %s1371_s10 = scalar_lea.hbm %s1746_s3, 4096 }
 0x177   : > { %p1368_p9 = scmp.ne.s32.totalorder %s1696_s11, %s1367_s30  ;;  %p1372_p5 = scmp.lt.u32.totalorder %s1696_s11, %s1746_s3 }
 0x178   : > { %p1373_p11 = scmp.lt.u32.totalorder %s1371_s10, %s1367_s30  ;;  %p1375_p4 = scmp.lt.u32.totalorder %s1367_s30, %s1696_s11 }
 0x179   : > { %p1369_p1 = pnand %p1368_p9, %p1546_p12 }
 0x17a   : > { %p1374_p2 = por %p1373_p11, %p1372_p5 }
 0x17b   : > { %p1370_p0 = pneg %p1369_p1 }
 0x17c   : > { %p1376_p6 = por %p1375_p4, %p1374_p2 }
 0x17e   : > { %p1377_p8 = pnand %p1376_p6, %p1370_p0 }
 0x180   : > { %1380 = shalt.err (!%p1377_p8)
}
 0x181   : > { %s1430_s20 = smov 64   ;;  %s1431_s8 = smov 4  }
 0x182   : > { %1216 = dma.vmem_to_hbm [thread:$0]  (%p1546_p12), %s1698_s4, 2048, %s1696_s11, %s824_s16, %s1430_s20, %s1430_s20, %s1431_s8  }
 0x183 PF: > { %s852_s9 = sand.u32 1, %s1411_s12   ;;  %p1761_p10 = scmp.ne.s32.totalorder %s1751_s19, 0 }
 0x184   : > { %p1762_p13 = scmp.ge.s32.totalorder %s1423_s15, 2  ;;  %s853_s25 = scalar_lea.sflag [#allocation4], %s852_s9 }
 0x186   : > { %p1227_p3 = pnand %p1762_p13, %p1761_p10 }
 0x188   : > { %1406 = dma.done.wait (!%p1227_p3), %s853_s25, 2048  }
 0x189   : > { %1408 = vsyncadd (!%p1227_p3), %s853_s25, 4294965248  ;;  %p17_p7 = scmp.ge.s32.totalorder %s1508_s24, 4   ;;  %s1763_s12 = smov %s1415_s13 }
 0x18a   : > { %s1764_s13 = smov %s1419_s14  ;;  %s1765_s14 = smov %s1542_s17 }
 0x18b   : > { %s1766_s15 = smov %s1508_s24  ;;  %19 = sbr.rel (!%p17_p7) target bundleno = 6 (0x6), region = 81 }
 0x192   :  { %858 = vsyncpa [#allocation3], 1 }
 0x193   :  { %860 = vsyncpa [#allocation3 + $0x1], 1 }
 0x194   :  { %861 = vsyncpa [#allocation6], 1 }
 0x195   :  { %862 = vsyncpa [#allocation4], 1 }
 0x196   :  { %864 = vsyncpa [#allocation4 + $0x1], 1 }

</bundles_post_ra>
